<compile_context>
chip_gen: v5e
topology: v5e:2x2
jax: 0.10.0
libtpu: 0.0.40
codegen_flags: <defaults>
</compile_context>

<pallas_src>
import functools

import jax
import jax.numpy as jnp
from jax.experimental import pallas as pl
from jax.experimental.pallas import tpu as pltpu


def _round_up(x, m):
    return ((x + m - 1) // m) * m


def patch_embed_kernel(patches_ref, w_ref, b_ref, out_ref):
    # patches_ref: (TM, Kp) bf16   w_ref: (Kp, Ep) bf16
    # b_ref:       (1, Ep) f32     out_ref: (TM, Ep)
    acc = jnp.dot(patches_ref[...], w_ref[...],
                  preferred_element_type=jnp.float32)
    out_ref[...] = (acc + b_ref[...]).astype(out_ref.dtype)


@functools.partial(jax.jit, static_argnames=("patch_size",))
def patch_embed_forward(x, weight, bias, patch_size):
    """x: (B, C, H, W) NCHW.  weight: (E, C, P, P) (PyTorch Conv2d OIHW).
    bias: (E,).  Returns (B, N, E) with N = (H//P) * (W//P)."""
    B, C, H, W = x.shape
    E = weight.shape[0]
    P = patch_size
    assert H % P == 0 and W % P == 0, "H, W must be divisible by patch_size"
    Hp, Wp = H // P, W // P
    N = Hp * Wp
    K = C * P * P
    M = B * N

    # ---- tiling / padding choices -------------------------------------
    K_pad = _round_up(K, 128)          # lane-dense matmul contraction
    E_pad = _round_up(E, 128)          # lane-dense output (unmasked stores)
    TM = 512 if M >= 512 else _round_up(M, 16)   # bf16 sublane packing = 16
    M_pad = _round_up(M, TM)

    # ---- glue: extract non-overlapping patches in (c, kh, kw) order ----
    # (B, C, Hp, P, Wp, P) -> (B, Hp, Wp, C, P, P) -> (B*N, K)
    patches = x.reshape(B, C, Hp, P, Wp, P)
    patches = patches.transpose(0, 2, 4, 1, 3, 5).reshape(M, K)
    patches = jnp.pad(patches.astype(jnp.bfloat16),
                      ((0, M_pad - M), (0, K_pad - K)))

    # Conv2d weight (E, C, P, P) -> matmul weight (K, E), zero-padded.
    w_mat = weight.reshape(E, K).T
    w_mat = jnp.pad(w_mat.astype(jnp.bfloat16),
                    ((0, K_pad - K), (0, E_pad - E)))
    b_mat = jnp.pad(bias.astype(jnp.float32), (0, E_pad - E)).reshape(1, E_pad)

    grid = (M_pad // TM,)

    bytes_accessed = (M_pad * K_pad * 2 +      # bf16 patches stream
                      K_pad * E_pad * 2 +      # bf16 weights (resident)
                      E_pad * 4 +              # f32 bias
                      M_pad * E_pad * x.dtype.itemsize)  # output

    out = pl.pallas_call(
        patch_embed_kernel,
        out_shape=jax.ShapeDtypeStruct((M_pad, E_pad), x.dtype),
        grid_spec=pltpu.PrefetchScalarGridSpec(
            num_scalar_prefetch=0,
            grid=grid,
            in_specs=[
                pl.BlockSpec((TM, K_pad), lambda i: (i, 0)),
                pl.BlockSpec((K_pad, E_pad), lambda i: (0, 0)),
                pl.BlockSpec((1, E_pad), lambda i: (0, 0)),
            ],
            out_specs=pl.BlockSpec((TM, E_pad), lambda i: (i, 0)),
        ),
        compiler_params=pltpu.CompilerParams(
            dimension_semantics=("parallel",)),
        cost_estimate=pl.CostEstimate(
            flops=2 * M_pad * K_pad * E_pad,
            transcendentals=0,
            bytes_accessed=bytes_accessed),
    )(patches, w_mat, b_mat)

    # strip padding, restore (B, N, E)
    return out[:M, :E].reshape(B, N, E)


if __name__ == "__main__":
    # Small shapes consistent with the module's forward:
    # img_size=16, patch_size=4, in_chans=3, embed_dim=32
    B, C, H, W = 2, 3, 16, 16
    P = 4
    E = 32
    N = (H // P) * (W // P)

    key = jax.random.PRNGKey(0)
    kx, kw, kb = jax.random.split(key, 3)

    x = jax.random.normal(kx, (B, C, H, W), dtype=jnp.float32)
    # Deterministic synthetic parameters (Conv2d layout: (embed_dim, C, P, P))
    weight = jax.random.normal(kw, (E, C, P, P), dtype=jnp.float32) * 0.02
    bias = jax.random.normal(kb, (E,), dtype=jnp.float32) * 0.02

    out = patch_embed_forward(x, weight, bias, P)
    out = jax.block_until_ready(out)
    assert out.shape == (B, N, E), out.shape

    # Reference: plain-JAX strided conv (== PyTorch Conv2d) + flatten/transpose.
    ref = jax.lax.conv_general_dilated(
        x, weight, window_strides=(P, P), padding="VALID",
        dimension_numbers=("NCHW", "OIHW", "NCHW"))  # (B, E, H/P, W/P)
    ref = ref + bias.reshape(1, E, 1, 1)
    ref = ref.reshape(B, E, N).transpose(0, 2, 1)  # flatten(2).transpose(1,2)

    # bf16 operands / f32 accumulation -> slightly looser tolerance.
    assert jnp.allclose(out, ref, atol=1e-2, rtol=1e-2), \
        float(jnp.max(jnp.abs(out - ref)))

    print("KERNEL_OK")
</pallas_src>

<mosaic_0001>
module attributes {stable_mosaic.version = 11 : i64} {
  func.func @patch_embed_kernel(%arg0: i32, %arg1: memref<32x128xbf16, #tpu.memory_space<vmem>>, %arg2: memref<128x128xbf16, #tpu.memory_space<vmem>>, %arg3: memref<1x128xf32, #tpu.memory_space<vmem>>, %arg4: memref<32x128xf32, #tpu.memory_space<vmem>>) attributes {dimension_semantics = [#tpu.dimension_semantics<parallel>], iteration_bounds = array<i64: 1>, scalar_prefetch = 0 : i64, scratch_operands = 0 : i64, tpu.core_type = #tpu.core_type<tc>, window_params = [{transform_indices = @transform_0, window_bounds = array<i64: 32, 128>}, {pipeline_mode = #tpu.pipeline_mode<synchronous>, transform_indices = @transform_1, window_bounds = array<i64: 128, 128>}, {pipeline_mode = #tpu.pipeline_mode<synchronous>, transform_indices = @transform_2, window_bounds = array<i64: 1, 128>}, {transform_indices = @transform_3, window_bounds = array<i64: 32, 128>}]} {
    %c0 = arith.constant 0 : index
    %c0_0 = arith.constant 0 : index
    %0 = vector.load %arg1[%c0, %c0_0] : memref<32x128xbf16, #tpu.memory_space<vmem>>, vector<32x128xbf16>
    %c0_1 = arith.constant 0 : index
    %c0_2 = arith.constant 0 : index
    %1 = vector.load %arg2[%c0_1, %c0_2] : memref<128x128xbf16, #tpu.memory_space<vmem>>, vector<128x128xbf16>
    %cst = arith.constant dense<0.000000e+00> : vector<32x128xf32>
    %2 = tpu.matmul %0, %1, %cst {dimension_numbers = #tpu.dot_dimension_numbers<[1], [0], [0], [1], [0, 0, 1, 1], [], []>} : vector<32x128xbf16>, vector<128x128xbf16>, vector<32x128xf32> -> vector<32x128xf32>
    %c0_3 = arith.constant 0 : index
    %c0_4 = arith.constant 0 : index
    %3 = vector.load %arg3[%c0_3, %c0_4] : memref<1x128xf32, #tpu.memory_space<vmem>>, vector<1x128xf32>
    %4 = vector.broadcast %3 : vector<1x128xf32> to vector<32x128xf32>
    %5 = arith.addf %2, %4 : vector<32x128xf32>
    %c0_5 = arith.constant 0 : index
    %c0_6 = arith.constant 0 : index
    %6 = vector.load %arg4[%c0_5, %c0_6] : memref<32x128xf32, #tpu.memory_space<vmem>>, vector<32x128xf32>
    tpu.vector_store %arg4[%c0_5, %c0_6], %5 {strides = array<i32>} : memref<32x128xf32, #tpu.memory_space<vmem>>, vector<32x128xf32>,
    return
  }
  func.func @transform_0(%arg0: i32) -> (i32, i32) {
    %c0_i32 = arith.constant 0 : i32
    %c0_i32_0 = arith.constant 0 : i32
    return %arg0, %c0_i32 : i32, i32
  }
  func.func @transform_1(%arg0: i32) -> (i32, i32) {
    %c0_i32 = arith.constant 0 : i32
    %c0_i32_0 = arith.constant 0 : i32
    %c0_i32_1 = arith.constant 0 : i32
    return %c0_i32, %c0_i32_0 : i32, i32
  }
  func.func @transform_2(%arg0: i32) -> (i32, i32) {
    %c0_i32 = arith.constant 0 : i32
    %c0_i32_0 = arith.constant 0 : i32
    %c0_i32_1 = arith.constant 0 : i32
    return %c0_i32, %c0_i32_0 : i32, i32
  }
  func.func @transform_3(%arg0: i32) -> (i32, i32) {
    %c0_i32 = arith.constant 0 : i32
    %c0_i32_0 = arith.constant 0 : i32
    return %arg0, %c0_i32 : i32, i32
  }
}

</mosaic_0001>

<bundles_post_ra>
// kernel: patch_embed_forward.1
= control target key start
LH: loop header
LB: loop body
LE: loop exit
PB: predicated region body
PF: predicated region fallthrough
CT: control target
= control target key end

     0   :  { %s287_s0 = inlined_call_operand.vmem [shape: bf16[32,128], index: 0, kind: input, shape index: {}]   ;;  %s288_s1 = inlined_call_operand.vmem [shape: bf16[128,128], index: 1, kind: input, shape index: {}]   ;;  %s289_s2 = inlined_call_operand.vmem [shape: f32[1,128], index: 2, kind: input, shape index: {}]   ;;  %s290_s3 = inlined_call_operand.hbm [shape: f32[32,128], index: 3, kind: output, shape index: {}]  }
   0x1   :  { %v189_v0 = vld [vmem:[%s288_s1 + $0x38] sm:$0xff]  ;;  %v188_v1 = vld [vmem:[%s288_s1 + $0x30] sm:$0xff] }
   0x2   :  { %99 = vmatpush.bf16.msra.mxu0 %v189_v0  ;;  %190 = vmatpush.bf16.msra.mxu1 %v189_v0 }
   0x3   :  { %8 = vsyncpa [#allocation3], 0  ;;  %v187_v2 = vld [vmem:[%s288_s1 + $0x28] sm:$0xff]  ;;  %v186_v3 = vld [vmem:[%s288_s1 + $0x20] sm:$0xff]  ;;  %s230_s10 = smov 8  }
   0x4   :  { %v185_v4 = vld [vmem:[%s288_s1 + $0x18] sm:$0xff]  ;;  %v184_v5 = vld [vmem:[%s288_s1 + $0x10] sm:$0xff]  ;;  %v183_v6 = vld [vmem:[%s288_s1 + $0x8] sm:$0xff] }
   0x5   :  { %v182_v7 = vld [vmem:[%s288_s1] sm:$0xff]  ;;  %v181_v9 = vld [vmem:[%s287_s0 + $0x8] sm:$0xff]  ;;  %s228_s1 = smov [#allocation2]  }
   0x6   :  { %100 = vmatpush.bf16.msra.mxu0 %v188_v1  ;;  %191 = vmatpush.bf16.msra.mxu1 %v188_v1  ;;  %v180_v8 = vld [vmem:[%s287_s0] sm:$0xff]  ;;  %s126_s7 = sshll.u32 %s228_s1, 4  ;;  %s128_s0 = sshll.u32 %s290_s3, 4  ;;  %s127_s7 = int_to_ptr.vmem [resolvable:$true] %s126_s7  ;;  %s129_s0 = int_to_ptr.hbm [resolvable:$true] %s128_s0 }
   0x7   :  { %v201_v10 = vld [vmem:[%s289_s2] ss:$0 sm:$0xff]  ;;  %s229_s2 = smov 128  }
   0xa   :  { %101 = vmatpush.bf16.msra.mxu0 %v187_v2  ;;  %192 = vmatpush.bf16.msra.mxu1 %v187_v2 }
   0xe   :  { %102 = vmatpush.bf16.msra.mxu0 %v186_v3  ;;  %193 = vmatpush.bf16.msra.mxu1 %v186_v3 }
  0x12   :  { %103 = vmatpush.bf16.msra.mxu0 %v185_v4  ;;  %194 = vmatpush.bf16.msra.mxu1 %v185_v4 }
  0x16   :  { %104 = vmatpush.bf16.msra.mxu0 %v184_v5  ;;  %195 = vmatpush.bf16.msra.mxu1 %v184_v5 }
  0x1a   :  { %105 = vmatpush.bf16.msra.mxu0 %v183_v6  ;;  %196 = vmatpush.bf16.msra.mxu1 %v183_v6 }
  0x1e   :  { %106 = vmatpush.bf16.msra.mxu0 %v182_v7  ;;  %197 = vmatpush.bf16.msra.mxu1 %v182_v7 }
  0x21   :  { %107 = vmatmul.bf16.vlgmr.msra.gmra.mxu0 %v180_v8  ;;  %112 = vmatmul.bf16.vlgmr.msra.gmra.mxu1 %v181_v9 }
  0x9e   :  { %v108_v11 = vpop.f32.mrf.mxu0  ;;  %v113_v12 = vpop.f32.mrf.mxu1 }
  0x9f   :  { %v109_v13 = vadd.f32 %v201_v10, %v108_v11  ;;  %v114_v14 = vadd.f32 %v201_v10, %v113_v12 }
  0xa1   :  { %118 = vst [vmem:[#allocation2] sm:$0xff] %v109_v13 }
  0xa2   :  { %120 = vst [vmem:[#allocation2 + $0x10] sm:$0xff] %v114_v14 }
  0xa6   :  { %v110_v15 = vpop.f32.mrf.mxu0  ;;  %v115_v16 = vpop.f32.mrf.mxu1 }
  0xa7   :  { %v111_v17 = vadd.f32 %v201_v10, %v110_v15  ;;  %v116_v18 = vadd.f32 %v201_v10, %v115_v16 }
  0xa9   :  { %119 = vst [vmem:[#allocation2 + $0x8] sm:$0xff] %v111_v17 }
  0xaa   :  { %121 = vst [vmem:[#allocation2 + $0x18] sm:$0xff] %v116_v18 }
  0xab   :  { %134 = dma.vmem_to_hbm [thread:$0]  %s127_s7, 512, %s129_s0, [#allocation3], %s229_s2, %s229_s2, %s230_s10  }
  0xac   :  { %226 = dma.done.wait [#allocation3], 512  }
  0xad   :  { %227 = vsyncadd [#allocation3], 4294966784 }
  0xae   :  { %139 = vsyncpa [#allocation3], 1 }

</bundles_post_ra>
